<compile_context>
chip_gen: v5e
topology: v5e:2x2
jax: 0.10.0
libtpu: 0.0.40
codegen_flags: <defaults>
</compile_context>

<pallas_src>
import functools

import jax
import jax.numpy as jnp
from jax import lax
from jax.experimental import pallas as pl
from jax.experimental.pallas import tpu as pltpu


def _rmsnorm_kernel(x_ref, w_ref, o_ref, *, eps):
    x = x_ref[...]                                     # (TM, D) native dtype
    xf = x.astype(jnp.float32)
    # f32 accumulation over d_model regardless of input dtype.
    ssq = jnp.sum(xf * xf, axis=-1, keepdims=True)     # (TM, 1)
    # Matches the PyTorch module: rms = sqrt(sum(x^2) + eps).
    inv = lax.rsqrt(ssq + eps)                         # EUP slot

    native_pass = jnp.issubdtype(x.dtype, jnp.floating) and x.dtype.itemsize < 4
    if native_pass:
        # Write-back pass in the packed native dtype (bf16/f16): halves vreg
        # count and VALU issues for the two D-wide multiplies and the store.
        o_ref[...] = ((x * inv.astype(x.dtype))
                      * w_ref[...].astype(x.dtype)).astype(o_ref.dtype)
    else:
        o_ref[...] = ((xf * inv)
                      * w_ref[...].astype(jnp.float32)).astype(o_ref.dtype)


def _sublane_pack(dtype):
    # f32 -> 8, bf16/f16 -> 16, int8/fp8 -> 32 rows per sublane group.
    return max(8, 32 // jnp.dtype(dtype).itemsize)


def _default_vmem_limit_bytes():
    phys = None
    try:
        phys = getattr(pltpu.get_tpu_info(), "vmem_capacity_bytes", None)
    except Exception:
        phys = None
    if not phys:
        phys = 64 << 20                                # conservative: v7x per-TC VMEM
    # Single headroom factor: leave 16 MiB for compiler-internal scratch and
    # never ask for more than 64 MiB — the tile picker targets ~8 MiB tiles,
    # so 4 pipeline buffers + the f32 working set fit comfortably on v5e/v6e/v7x.
    return int(min(max(phys - (16 << 20), 32 << 20), 64 << 20))


def _pick_row_tile(n_rows, d_model, dtype, vmem_limit_bytes, min_grid_steps=4):
    """Row tile: multiple of the sublane packing, ~8 MiB, VMEM-budgeted, and
    small enough that the grid has >= min_grid_steps steps when possible."""
    itemsize = jnp.dtype(dtype).itemsize
    pack = _sublane_pack(dtype)
    n_rows_padded = pl.cdiv(n_rows, pack) * pack

    # Per-row VMEM footprint: in + out tile in the native dtype, plus the f32
    # working set of the upcast x that is live across the reduction for
    # sub-32-bit inputs (matters on v7x's 64 MiB VMEM).
    f32_extra = 4 if itemsize < 4 else 0
    bytes_per_row = max(1, d_model * (2 * itemsize + f32_extra))

    # One headroom factor: /5 covers 4 pipeline buffers (2 in + 2 out) + slack.
    vmem_rows = max(pack, (vmem_limit_bytes // 5) // bytes_per_row)

    # ~8 MiB native-dtype tiles already sit near the HBM roofline; bigger
    # tiles just trade away pipelining overlap.
    sweet_rows = max(pack, (8 << 20) // max(1, d_model * itemsize))

    # Keep >= min_grid_steps grid steps when the row count allows it: software
    # pipelining needs >=2 steps, and v7x's two TensorCores only both engage
    # when the "parallel" axis has >=2 blocks to shard.
    steps_rows = max(pack, pl.cdiv(n_rows_padded, min_grid_steps))

    tm = min(vmem_rows, sweet_rows, steps_rows)
    tm = max(pack, (tm // pack) * pack)
    return min(tm, n_rows_padded)


def rmsnorm(x, weight, eps=1e-6, block_rows=None, vmem_limit_bytes=None,
            input_buffers=None):
    """x: (..., d_model), weight: (d_model,). Returns same shape/dtype as x."""
    orig_shape = x.shape
    d_model = orig_shape[-1]
    n_rows = 1
    for s in orig_shape[:-1]:
        n_rows *= s
    n_rows = max(n_rows, 1)

    x2d = x.reshape(n_rows, d_model)
    w2d = weight.reshape(1, d_model)

    # Lane-dense last dim: pad features to a multiple of 128 so every store is
    # an unmasked full-lane vst. Exact: zeros add nothing to sum(x^2) and the
    # padded weight columns are zero; padded output columns are sliced off.
    d_pad = pl.cdiv(d_model, 128) * 128
    if d_pad != d_model:
        x2d = jnp.pad(x2d, ((0, 0), (0, d_pad - d_model)))
        w2d = jnp.pad(w2d, ((0, 0), (0, d_pad - d_model)))

    if vmem_limit_bytes is None:
        vmem_limit_bytes = _default_vmem_limit_bytes()

    pack = _sublane_pack(x.dtype)
    if block_rows is None:
        tm = _pick_row_tile(n_rows, d_pad, x.dtype, vmem_limit_bytes)
    else:
        n_rows_padded = pl.cdiv(n_rows, pack) * pack
        tm = max(pack, (int(block_rows) // pack) * pack)
        tm = min(tm, n_rows_padded)

    # Partial last block (n_rows % tm != 0) is masked by Pallas; rows are
    # independent, so padded garbage rows never contaminate real outputs.
    grid = (pl.cdiv(n_rows, tm),)

    x_spec_kwargs = {}
    if input_buffers is not None and int(input_buffers) != 2:
        # Optional deeper input pipelining (worth sweeping on v7x).
        x_spec_kwargs = dict(pipeline_mode=pl.Buffered(int(input_buffers)))

    itemsize = jnp.dtype(x.dtype).itemsize
    cost = pl.CostEstimate(
        flops=3 * n_rows * d_pad,
        transcendentals=n_rows,
        bytes_accessed=2 * n_rows * d_pad * itemsize
        + d_pad * jnp.dtype(weight.dtype).itemsize,
    )

    out2d = pl.pallas_call(
        functools.partial(_rmsnorm_kernel, eps=eps),
        out_shape=jax.ShapeDtypeStruct((n_rows, d_pad), x.dtype),
        grid_spec=pltpu.PrefetchScalarGridSpec(
            num_scalar_prefetch=0,
            grid=grid,
            in_specs=[
                pl.BlockSpec((tm, d_pad), lambda i: (i, 0), **x_spec_kwargs),  # row tile of x
                pl.BlockSpec((1, d_pad), lambda i: (0, 0)),                    # weight, VMEM-resident
            ],
            out_specs=pl.BlockSpec((tm, d_pad), lambda i: (i, 0)),
        ),
        compiler_params=pltpu.CompilerParams(
            dimension_semantics=("parallel",),   # shards row blocks across v7x's 2 TCs
            vmem_limit_bytes=int(vmem_limit_bytes),
        ),
        cost_estimate=cost,
    )(x2d, w2d)

    if d_pad != d_model:
        out2d = out2d[:, :d_model]
    return out2d.reshape(orig_shape)


def rmsnorm_ref(x, weight, eps=1e-6):
    """Pure-JAX reference mirroring the PyTorch forward exactly."""
    norm = jnp.linalg.norm(x, ord=2, axis=-1, keepdims=True)
    rms = jnp.sqrt(jnp.mean(norm ** 2, axis=-1, keepdims=True) + eps)
    return weight * x / rms


if __name__ == "__main__":
    key = jax.random.PRNGKey(0)

    # Module-implied shapes: (batch, seq, d_model); weight = ones(d_model).
    batch, seq, d_model = 2, 8, 32
    x = jax.random.normal(key, (batch, seq, d_model), dtype=jnp.float32)
    weight = jnp.ones((d_model,), dtype=jnp.float32)

    out = jax.block_until_ready(rmsnorm(x, weight, eps=1e-6))
    ref = rmsnorm_ref(x, weight, eps=1e-6)
    assert out.shape == x.shape and out.dtype == x.dtype
    assert jnp.allclose(out, ref, atol=1e-5, rtol=1e-5), "mismatch vs reference (f32)"

    # Non-divisible row count: exercises cdiv + masked-last-block and the
    # feature-padding (d_model=32 -> 128) lane-dense path.
    x2 = jax.random.normal(jax.random.PRNGKey(1), (3, 5, d_model), dtype=jnp.float32)
    out2 = jax.block_until_ready(rmsnorm(x2, weight, eps=1e-6))
    ref2 = rmsnorm_ref(x2, weight, eps=1e-6)
    assert jnp.allclose(out2, ref2, atol=1e-5, rtol=1e-5), "mismatch vs reference (ragged rows)"

    # bf16 input: f32 accumulation + native-dtype (packed) write-back pass.
    xb = jax.random.normal(jax.random.PRNGKey(2), (4, 8, 128), dtype=jnp.bfloat16)
    wb = jnp.ones((128,), dtype=jnp.bfloat16)
    outb = jax.block_until_ready(rmsnorm(xb, wb, eps=1e-6))
    refb = rmsnorm_ref(xb.astype(jnp.float32), wb.astype(jnp.float32), eps=1e-6)
    assert outb.shape == xb.shape and outb.dtype == xb.dtype
    assert jnp.allclose(outb.astype(jnp.float32), refb, atol=2e-2, rtol=5e-2), \
        "mismatch vs reference (bf16)"

    print("KERNEL_OK")
</pallas_src>

<mosaic_0001>
module attributes {stable_mosaic.version = 11 : i64} {
  func.func @_rmsnorm_kernel(%arg0: i32, %arg1: memref<8x128xf32, #tpu.memory_space<vmem>>, %arg2: memref<1x128xf32, #tpu.memory_space<vmem>>, %arg3: memref<8x128xf32, #tpu.memory_space<vmem>>) attributes {dimension_semantics = [#tpu.dimension_semantics<parallel>], iteration_bounds = array<i64: 2>, scalar_prefetch = 0 : i64, scratch_operands = 0 : i64, tpu.core_type = #tpu.core_type<tc>, window_params = [{transform_indices = @transform_0, window_bounds = array<i64: 8, 128>}, {pipeline_mode = #tpu.pipeline_mode<synchronous>, transform_indices = @transform_1, window_bounds = array<i64: 1, 128>}, {transform_indices = @transform_2, window_bounds = array<i64: 8, 128>}]} {
    %c0 = arith.constant 0 : index
    %c0_0 = arith.constant 0 : index
    %0 = vector.load %arg1[%c0, %c0_0] : memref<8x128xf32, #tpu.memory_space<vmem>>, vector<8x128xf32>
    %1 = arith.mulf %0, %0 : vector<8x128xf32>
    %cst = arith.constant dense<0.000000e+00> : vector<8xf32>
    %2 = vector.multi_reduction <add>, %1, %cst [1] : vector<8x128xf32> to vector<8xf32>
    %3 = vector.shape_cast %2 : vector<8xf32> to vector<8x1xf32>
    %cst_1 = arith.constant 9.99999997E-7 : f32
    %4 = vector.broadcast %cst_1 : f32 to vector<8x1xf32>
    %5 = arith.addf %3, %4 : vector<8x1xf32>
    %6 = math.rsqrt %5 : vector<8x1xf32>
    %7 = vector.broadcast %6 : vector<8x1xf32> to vector<8x128xf32>
    %8 = arith.mulf %0, %7 : vector<8x128xf32>
    %c0_2 = arith.constant 0 : index
    %c0_3 = arith.constant 0 : index
    %9 = vector.load %arg2[%c0_2, %c0_3] : memref<1x128xf32, #tpu.memory_space<vmem>>, vector<1x128xf32>
    %10 = vector.broadcast %9 : vector<1x128xf32> to vector<8x128xf32>
    %11 = arith.mulf %8, %10 : vector<8x128xf32>
    %c0_4 = arith.constant 0 : index
    %c0_5 = arith.constant 0 : index
    %12 = vector.load %arg3[%c0_4, %c0_5] : memref<8x128xf32, #tpu.memory_space<vmem>>, vector<8x128xf32>
    tpu.vector_store %arg3[%c0_4, %c0_5], %11 {strides = array<i32>} : memref<8x128xf32, #tpu.memory_space<vmem>>, vector<8x128xf32>,
    return
  }
  func.func @transform_0(%arg0: i32) -> (i32, i32) {
    %c0_i32 = arith.constant 0 : i32
    %c0_i32_0 = arith.constant 0 : i32
    return %arg0, %c0_i32 : i32, i32
  }
  func.func @transform_1(%arg0: i32) -> (i32, i32) {
    %c0_i32 = arith.constant 0 : i32
    %c0_i32_0 = arith.constant 0 : i32
    %c0_i32_1 = arith.constant 0 : i32
    return %c0_i32, %c0_i32_0 : i32, i32
  }
  func.func @transform_2(%arg0: i32) -> (i32, i32) {
    %c0_i32 = arith.constant 0 : i32
    %c0_i32_0 = arith.constant 0 : i32
    return %arg0, %c0_i32 : i32, i32
  }
}

</mosaic_0001>

<bundles_post_ra>
// kernel: tpu_custom_call.1
= control target key start
LH: loop header
LB: loop body
LE: loop exit
PB: predicated region body
PF: predicated region fallthrough
CT: control target
= control target key end

     0   :  { %7 = vsyncpa [#allocation3], 0  ;;  %s654_s0 = inlined_call_operand.hbm [shape: f32[16,128], index: 0, kind: input, shape index: {}]   ;;  %s655_s1 = inlined_call_operand.hbm [shape: f32[1,128], index: 1, kind: input, shape index: {}]   ;;  %s656_s2 = inlined_call_operand.hbm [shape: f32[16,128], index: 2, kind: output, shape index: {}]  }
   0x1   :  { %9 = vsyncpa [#allocation3 + $0x1], 0 }
   0x2   :  { %10 = vsyncpa [#allocation6], 0 }
   0x3   :  { %11 = vsyncpa [#allocation4], 0 }
   0x4   :  { %13 = vsyncpa [#allocation4 + $0x1], 0  ;;  %s516_s9 = smov 0   ;;  %s518_s10 = smov 0  }
   0x5   :  { %s520_s11 = smov 0   ;;  %s522_s12 = smov 0  }
   0x6 LB: > { %s537_s13 = sadd.s32 4294967295, %s498_s12   ;;  %s294_s14 = sadd.s32 4294967294, %s498_s12   ;;  %s498_s12 = sphi %s522_s12, %s666_s12   ;;  %s494_s11 = sphi %s520_s11, %s665_s11   ;;  %s490_s10 = sphi %s518_s10, %s664_s10   ;;  %s486_s9 = sphi %s516_s9, %s663_s9  }
   0x7   : > { %p39_p0 = scmp.ne.s32.totalorder %s490_s10, %s486_s9  ;;  %p40_p1 = scmp.eq.s32.totalorder %s537_s13, 0 }
   0x8   : > { %p84_p2 = scmp.eq.s32.totalorder %s537_s13, 1  ;;  %p90_p3 = scmp.eq.s32.totalorder %s294_s14, 1 }
   0x9   : > { %p546_p4 = por %p40_p1, %p39_p0  ;;  %p295_p5 = scmp.ge.s32.totalorder %s498_s12, 1 }
   0xa   : > { %p551_p6 = por %p90_p3, %p39_p0  ;;  %p97_p7 = scmp.lt.s32.totalorder %s498_s12, 3 }
   0xb   : > { %s109_s19 = sshll.u32 %s655_s1, 4  ;;  %s500_s21 = smov [#allocation5]   ;;  %s110_s19 = int_to_ptr.hbm [resolvable:$true] %s109_s19 }
   0xc   : > { %p559_p8 = pnand %p295_p5, %p97_p7  ;;  %s111_s22 = sshll.u32 %s500_s21, 4  ;;  %s112_s22 = int_to_ptr.vmem [resolvable:$true] %s111_s22 }
   0xd   : > { %s569_s23 = sadd.s32 1, %s498_s12   ;;  %s26_s24 = sadd.s32 1, %s494_s11 }
   0xe   : > { %p316_p10 = pneg %p559_p8  ;;  %s23_s25 = ssub.s32 %s498_s12, %s569_s23 }
   0xf   : > { %p24_p12 = scmp.eq.s32.totalorder %s23_s25, 0  ;;  %p33_p13 = scmp.ne.s32.totalorder %s494_s11, %s490_s10 }
  0x10   : > { %p317_p11 = pnand %p316_p10, %p40_p1  ;;  %p34_p0 = scmp.eq.s32.totalorder %s498_s12, 0 }
  0x11   : > { %s578_s26 = scalar_select %p24_p12, %s494_s11, %s26_s24  }
  0x12   : > { %319 = dma.hbm_to_vmem [thread:$0]  (!%p317_p11), %s110_s19, 16, %s112_s22, [#allocation6]  }
  0x13   : > { %p582_p3 = por %p84_p2, %p33_p13  ;;  %p329_p5 = scmp.lt.s32.totalorder %s498_s12, 2 }
  0x14   : > { %s122_s28 = sand.u32 1, %s494_s11   ;;  %s299_s29 = sshll.u32 %s498_s12, 3 }
  0x15   : > { %p35_p7 = por %p34_p0, %p33_p13  ;;  %s298_s30 = sshll.u32 %s122_s28, 3 }
  0x16   : > { %s130_s5 = scalar_lea.hbm %s654_s0, %s299_s29  ;;  %s126_s7 = scalar_lea.vmem [#allocation2], %s298_s30 }
  0x17   : > { %s132_s6 = sshll.u32 %s130_s5, 4  ;;  %s134_s8 = sshll.u32 %s126_s7, 4  ;;  %s133_s6 = int_to_ptr.hbm [resolvable:$true] %s132_s6  ;;  %s135_s8 = int_to_ptr.vmem [resolvable:$true] %s134_s8 }
  0x18   : > { %p592_p10 = pnand %p329_p5, %p35_p7  ;;  %s123_s17 = scalar_lea.sflag [#allocation3], %s122_s28 }
  0x19   : > { %s398_s18 = sshra.s32 %s133_s6, 4  ;;  %s405_s24 = scalar_lea.hbm %s654_s0, 16  ;;  %s399_s18 = int_to_ptr.hbm [resolvable:$true] %s398_s18 }
  0x1a   : > { %s400_s19 = scalar_lea.hbm %s399_s18, 8  ;;  %p402_p11 = pneg %p592_p10 }
  0x1b   : > { %p401_p2 = scmp.ne.s32.totalorder %s399_s18, %s400_s19  ;;  %p406_p0 = scmp.lt.s32.totalorder %s399_s18, %s654_s0 }
  0x1c   : > { %p407_p5 = scmp.lt.s32.totalorder %s405_s24, %s400_s19 }
  0x1d   : > { %p403_p12 = pnand %p402_p11, %p401_p2 }
  0x1e   : > { %p408_p7 = por %p407_p5, %p406_p0 }
  0x1f   : > { %p404_p13 = pneg %p403_p12 }
  0x21   : > { %p409_p9 = pnand %p408_p7, %p404_p13 }
  0x23   : > { %412 = shalt.err (!%p409_p9)
}
  0x24   : > { %323 = dma.hbm_to_vmem [thread:$0]  (!%p592_p10), %s133_s6, 128, %s135_s8, %s123_s17  }
  0x25   : > { %143 = sbr.rel (%p559_p8) target bundleno = 191 (0xbf), region = 28  ;;  %s609_s28 = sand.u32 (!%p559_p8), 1, %s490_s10  }
  0x26   : > { %s301_s30 = sshll.u32 (!%p559_p8), %s609_s28, 3  ;;  %s146_s3 = scalar_lea.sflag (!%p559_p8), [#allocation3], %s609_s28 }
  0x27   : > { %s149_s4 = scalar_lea.vmem (!%p559_p8), [#allocation2], %s301_s30 }
  0x2a   : > { %473 = dma.done.wait (%p546_p4), %s146_s3, 128  }
  0x2b   : > { %475 = vsyncadd (%p546_p4), %s146_s3, 4294967168 }
  0x2c   : > { %477 = dma.done.wait (%p40_p1), [#allocation6], 16  }
  0x2d   : > { %479 = vsyncadd (%p40_p1), [#allocation6], 4294967280  ;;  %v176_v0 = vld [vmem:[%s149_s4] sm:$0xff]  ;;  %s305_s20 = sshll.u32 %s537_s13, 3  ;;  %v365_v10 = vld [vmem:[#allocation5] ss:$0 sm:$0xff] }
  0x2e   : > { %v177_v1 = vmul.f32 %v176_v0, %v176_v0  ;;  %s209_s6 = scalar_lea.hbm %s656_s2, %s305_s20  ;;  %s175_s7 = scalar_lea.vmem [#allocation7], %s301_s30 }
  0x2f   : > { %s211_s8 = sshll.u32 %s175_s7, 4  ;;  %s213_s14 = sshll.u32 %s209_s6, 4  ;;  %s212_s8 = int_to_ptr.vmem [resolvable:$true] %s211_s8  ;;  %s214_s14 = int_to_ptr.hbm [resolvable:$true] %s213_s14 }
  0x30   : > { %178 = vadd.xlane.f32.xlu0 %v177_v1  ;;  %s199_s13 = scalar_lea.sflag [#allocation4], %s609_s28  ;;  %s442_s17 = sshra.s32 %s214_s14, 4  ;;  %s443_s17 = int_to_ptr.hbm [resolvable:$true] %s442_s17 }
  0x31   : > { %s444_s18 = scalar_lea.hbm %s443_s17, 8  ;;  %s448_s22 = scalar_lea.hbm %s656_s2, 16 }
  0x32   : > { %p445_p1 = scmp.ne.s32.totalorder %s443_s17, %s444_s18  ;;  %p449_p9 = scmp.lt.s32.totalorder %s443_s17, %s656_s2 }
  0x33   : > { %p450_p10 = scmp.lt.s32.totalorder %s448_s22, %s444_s18 }
  0x34   : > { %p446_p4 = pnand %p445_p1, %p582_p3 }
  0x35   : > { %p451_p2 = por %p450_p10, %p449_p9 }
  0x36   : > { %p447_p8 = pneg %p446_p4 }
  0x38   : > { %p452_p11 = pnand %p451_p2, %p447_p8 }
  0xa3   : > { %v179_v2 = vpop.xlane.xlu0 %178 }
  0xa4   : > { %v180_v3 = vadd.f32 1e-06, %v179_v2 }
  0xa6   : > { %366 = vrsqrt.f32 %v180_v3  ;;  %vm187_vm1 = vweird.f32 %v180_v3 }
  0xac   : > { %v367_v4 = vpop.eup %366 }
  0xad   : > { %v182_v5 = vmul.f32 %v367_v4, %v180_v3  ;;  %vm188_vm0 = vweird.f32 %v367_v4 }
  0xae   : > { %vm189_vm2 = vmor %vm187_vm1, %vm188_vm0 }
  0xaf   : > { %v183_v6 = vmul.f32 %v367_v4, %v182_v5 }
  0xb1   : > { %v184_v7 = vmul.f32 0.5, %v183_v6 }
  0xb3   : > { %v185_v8 = vsub.f32 1.5, %v184_v7 }
  0xb5   : > { %v186_v9 = vmul.f32 %v367_v4, %v185_v8 }
  0xb7   : > { %v190_v11 = vsel %vm189_vm2, %v367_v4, %v186_v9 }
  0xb8   : > { %v191_v12 = vmul.f32 %v190_v11, %v176_v0 }
  0xba   : > { %v196_v13 = vmul.f32 %v365_v10, %v191_v12 }
  0xbc   : > { %197 = vst [vmem:[%s175_s7] sm:$0xff] %v196_v13 }
  0xbd   : > { %455 = shalt.err (!%p452_p11)
}
  0xbe   : > { %314 = dma.vmem_to_hbm [thread:$0]  (%p582_p3), %s212_s8, 128, %s214_s14, %s199_s13  }
  0xbf PF: > { %s225_s29 = sand.u32 1, %s486_s9   ;;  %p662_p12 = scmp.ge.s32.totalorder %s498_s12, 2 }
  0xc0   : > { %s226_s28 = scalar_lea.sflag [#allocation4], %s225_s29 }
  0xc1   : > { %p325_p13 = pnand %p662_p12, %p551_p6 }
  0xc3   : > { %p326_p0 = pneg %p325_p13 }
  0xc5   : > { %481 = dma.done.wait (%p326_p0), %s226_s28, 128  }
  0xc6   : > { %483 = vsyncadd (%p326_p0), %s226_s28, 4294967168  ;;  %p16_p5 = scmp.ge.s32.totalorder %s569_s23, 4   ;;  %s663_s9 = smov %s490_s10 }
  0xc7   : > { %s664_s10 = smov %s494_s11  ;;  %s665_s11 = smov %s578_s26 }
  0xc8   : > { %s666_s12 = smov %s569_s23  ;;  %18 = sbr.rel (!%p16_p5) target bundleno = 6 (0x6), region = 77 }
  0xcd   :  { %232 = vsyncpa [#allocation3], 1 }
  0xce   :  { %234 = vsyncpa [#allocation3 + $0x1], 1 }
  0xcf   :  { %235 = vsyncpa [#allocation6], 1 }
  0xd0   :  { %236 = vsyncpa [#allocation4], 1 }
  0xd1   :  { %238 = vsyncpa [#allocation4 + $0x1], 1 }

</bundles_post_ra>
